<compile_context>
chip_gen: v5e
topology: v5e:2x2
jax: 0.10.0
libtpu: 0.0.40
codegen_flags: <defaults>
</compile_context>

<pallas_src>
import jax
import jax.numpy as jnp
import numpy as np
from jax.experimental import pallas as pl
from jax.experimental.pallas import tpu as pltpu

_INV_LN10 = float(1.0 / np.log(10.0))


def _recon_kernel(s_ref, basis_ref, o_ref):
    # s_ref     : (tm_eff, a_len)       spectra tile (native dtype, cast here)
    # basis_ref : (a_len, 2*a_pad)      window-folded [cos | -sin] DFT basis
    # o_ref     : (tm_eff, a_pad)       log10 magnitude (f32), padded lanes junk
    a_pad = o_ref.shape[-1]
    s = s_ref[...].astype(basis_ref.dtype)
    ri = jnp.dot(s, basis_ref[...], preferred_element_type=jnp.float32)
    re = ri[:, :a_pad]            # static 128-lane-aligned slices (free views)
    im = ri[:, a_pad:]
    # log10(|B|) = 0.5 * log(re^2 + im^2) / ln(10)
    o_ref[...] = (jnp.log(re * re + im * im)
                  * jnp.float32(0.5 * _INV_LN10)).astype(o_ref.dtype)


def _round_up(x: int, m: int) -> int:
    return ((x + m - 1) // m) * m


def make_reconstruction(a_len: int, tm: int = 512, basis_dtype=jnp.float32):
    """Builds the window-folded DFT basis and the Pallas-backed forward.

    basis_dtype: jnp.float32 (default, most accurate) or jnp.bfloat16
                 (recommended on v5e where f32 MXU operands are multi-pass).
    """
    a_pad = _round_up(a_len, 128)           # lane-aligned half-width of result

    n = np.arange(a_len)
    # torch.hann_window default is periodic=True: 0.5 * (1 - cos(2*pi*n / N))
    window = 0.5 * (1.0 - np.cos(2.0 * np.pi * n / a_len))

    # FFT with n = 2*a_len, bins k in [0, a_len):
    #   B[k] = sum_n S_w[n] * exp(-i * pi * k * n / a_len)
    kk, nn = np.meshgrid(np.arange(a_len), np.arange(a_len), indexing="ij")
    theta = np.pi * kk * nn / a_len                         # (k, n)
    cos_b = np.zeros((a_len, a_pad), np.float64)
    sin_b = np.zeros((a_len, a_pad), np.float64)
    cos_b[:, :a_len] = np.cos(theta).T                      # (n, k)
    sin_b[:, :a_len] = -np.sin(theta).T
    # Fold the hann window (diag scaling on the contraction axis) into the
    # constant basis; concatenate real/imag halves on a 128-lane boundary.
    basis_np = np.concatenate([cos_b, sin_b], axis=1) * window[:, None]
    basis = jnp.asarray(basis_np, dtype=basis_dtype)        # (a_len, 2*a_pad)
    window_j = jnp.asarray(window, dtype=jnp.float32)

    # Constant basis: single-buffered (index_map never changes -> one DMA,
    # second buffer would be wasted VMEM).  Fall back gracefully if this JAX
    # version's BlockSpec has no pipeline_mode kwarg.
    try:
        basis_spec = pl.BlockSpec((a_len, 2 * a_pad), lambda i: (0, 0),
                                  pipeline_mode=pl.Buffered(1))
        basis_bufs = 1
    except TypeError:
        basis_spec = pl.BlockSpec((a_len, 2 * a_pad), lambda i: (0, 0))
        basis_bufs = 2

    @jax.jit
    def forward(S):
        orig_shape = S.shape
        assert orig_shape[-1] == a_len
        s2d = S.reshape(-1, a_len)            # native dtype; cast in-kernel
        M = s2d.shape[0]

        # Rows per grid step: as large as `tm` for MXU/DMA efficiency, but
        # always >= 2 grid steps when there is enough work so that v7x's two
        # TensorCores each get a parallel block (no effect on v5e/v6e).
        half = -(-M // 2)
        tm_eff = min(tm, max(8, _round_up(half, 8)))
        grid = pl.cdiv(M, tm_eff)             # ragged last block handled by Pallas

        # Scoped-VMEM budget from the actual tiles (never below the default).
        vmem_bytes = (2 * tm_eff * a_len * s2d.dtype.itemsize      # in, 2-buf
                      + 2 * tm_eff * a_pad * 4                     # out, 2-buf
                      + basis_bufs * a_len * 2 * a_pad * basis.dtype.itemsize)
        vmem_limit = int(min(max(2 * vmem_bytes + (4 << 20), 32 << 20),
                             100 << 20))

        out = pl.pallas_call(
            _recon_kernel,
            out_shape=jax.ShapeDtypeStruct((M, a_pad), jnp.float32),
            grid_spec=pltpu.PrefetchScalarGridSpec(
                num_scalar_prefetch=0,
                grid=(grid,),
                in_specs=[
                    pl.BlockSpec((tm_eff, a_len), lambda i: (i, 0)),
                    basis_spec,
                ],
                out_specs=pl.BlockSpec((tm_eff, a_pad), lambda i: (i, 0)),
            ),
            compiler_params=pltpu.CompilerParams(
                dimension_semantics=("parallel",),
                vmem_limit_bytes=vmem_limit,
            ),
        )(s2d, basis)

        if a_pad != a_len:                    # only when a_len % 128 != 0
            out = out[:, :a_len]
        return out.reshape(orig_shape)

    return forward, window_j


def _reference(S, a_len, window):
    # Pure-JAX reference matching the PyTorch semantics.
    Sw = S.astype(jnp.float32) * window.reshape(a_len)
    B = jnp.fft.fft(Sw, n=2 * a_len, axis=-1)[..., :a_len]
    return jnp.log10(jnp.abs(B))


if __name__ == "__main__":
    a_len = 128
    forward, window = make_reconstruction(a_len)
    key = jax.random.PRNGKey(0)
    k1, k2 = jax.random.split(key)

    # Case 1: small batch (M = 8), single grid step.
    S1 = jax.random.normal(k1, (2, 4, a_len), dtype=jnp.float32)
    out1 = jax.block_until_ready(forward(S1))
    ref1 = _reference(S1, a_len, window)
    np.testing.assert_allclose(np.asarray(out1), np.asarray(ref1),
                               rtol=1e-3, atol=1e-3)

    # Case 2: batch not a multiple of the tile (M = 15) — exercises the
    # ragged-last-block path (no host-side padding/slicing anymore).
    S2 = jax.random.normal(k2, (3, 5, a_len), dtype=jnp.float32)
    out2 = jax.block_until_ready(forward(S2))
    ref2 = _reference(S2, a_len, window)
    np.testing.assert_allclose(np.asarray(out2), np.asarray(ref2),
                               rtol=1e-3, atol=1e-3)

    print("KERNEL_OK")
</pallas_src>

<mosaic_0001>
module attributes {stable_mosaic.version = 11 : i64} {
  func.func @_recon_kernel(%arg0: i32, %arg1: memref<8x128xf32, #tpu.memory_space<vmem>>, %arg2: memref<128x256xf32, #tpu.memory_space<vmem>>, %arg3: memref<8x128xf32, #tpu.memory_space<vmem>>) attributes {dimension_semantics = [#tpu.dimension_semantics<parallel>], iteration_bounds = array<i64: 1>, scalar_prefetch = 0 : i64, scratch_operands = 0 : i64, tpu.core_type = #tpu.core_type<tc>, window_params = [{transform_indices = @transform_0, window_bounds = array<i64: 8, 128>}, {pipeline_mode = #tpu.pipeline_mode<synchronous>, transform_indices = @transform_1, window_bounds = array<i64: 128, 256>}, {transform_indices = @transform_2, window_bounds = array<i64: 8, 128>}]} {
    %c0 = arith.constant 0 : index
    %c0_0 = arith.constant 0 : index
    %0 = vector.load %arg1[%c0, %c0_0] : memref<8x128xf32, #tpu.memory_space<vmem>>, vector<8x128xf32>
    %c0_1 = arith.constant 0 : index
    %c0_2 = arith.constant 0 : index
    %1 = vector.load %arg2[%c0_1, %c0_2] : memref<128x256xf32, #tpu.memory_space<vmem>>, vector<128x256xf32>
    %cst = arith.constant dense<0.000000e+00> : vector<8x256xf32>
    %2 = tpu.matmul %0, %1, %cst {dimension_numbers = #tpu.dot_dimension_numbers<[1], [0], [0], [1], [0, 0, 1, 1], [], []>} : vector<8x128xf32>, vector<128x256xf32>, vector<8x256xf32> -> vector<8x256xf32>
    %3 = vector.extract_strided_slice %2 {offsets = [0, 0], sizes = [8, 128], strides = [1, 1]} : vector<8x256xf32> to vector<8x128xf32>
    %4 = vector.extract_strided_slice %2 {offsets = [0, 128], sizes = [8, 128], strides = [1, 1]} : vector<8x256xf32> to vector<8x128xf32>
    %5 = arith.mulf %3, %3 : vector<8x128xf32>
    %6 = arith.mulf %4, %4 : vector<8x128xf32>
    %7 = arith.addf %5, %6 : vector<8x128xf32>
    %8 = math.log %7 : vector<8x128xf32>
    %cst_3 = arith.constant 0.217147246 : f32
    %9 = vector.broadcast %cst_3 : f32 to vector<8x128xf32>
    %10 = arith.mulf %8, %9 : vector<8x128xf32>
    %c0_4 = arith.constant 0 : index
    %c0_5 = arith.constant 0 : index
    %11 = vector.load %arg3[%c0_4, %c0_5] : memref<8x128xf32, #tpu.memory_space<vmem>>, vector<8x128xf32>
    tpu.vector_store %arg3[%c0_4, %c0_5], %10 {strides = array<i32>} : memref<8x128xf32, #tpu.memory_space<vmem>>, vector<8x128xf32>,
    return
  }
  func.func @transform_0(%arg0: i32) -> (i32, i32) {
    %c0_i32 = arith.constant 0 : i32
    %c0_i32_0 = arith.constant 0 : i32
    return %arg0, %c0_i32 : i32, i32
  }
  func.func @transform_1(%arg0: i32) -> (i32, i32) {
    %c0_i32 = arith.constant 0 : i32
    %c0_i32_0 = arith.constant 0 : i32
    %c0_i32_1 = arith.constant 0 : i32
    return %c0_i32, %c0_i32_0 : i32, i32
  }
  func.func @transform_2(%arg0: i32) -> (i32, i32) {
    %c0_i32 = arith.constant 0 : i32
    %c0_i32_0 = arith.constant 0 : i32
    return %arg0, %c0_i32 : i32, i32
  }
}

</mosaic_0001>

<bundles_post_ra>
// kernel: forward.1
= control target key start
LH: loop header
LB: loop body
LE: loop exit
PB: predicated region body
PF: predicated region fallthrough
CT: control target
= control target key end

     0   :  { %7 = vsyncpa [#allocation3], 0  ;;  %s254_s0 = inlined_call_operand.hbm [shape: f32[8,128], index: 0, kind: input, shape index: {}]   ;;  %s255_s1 = inlined_call_operand.hbm [shape: f32[128,256], index: 1, kind: input, shape index: {}]   ;;  %s256_s2 = inlined_call_operand.hbm [shape: f32[8,128], index: 2, kind: output, shape index: {}]  }
   0x1   :  { %8 = vsyncpa [#allocation6], 0 }
   0x2   :  { %9 = vsyncpa [#allocation4], 0  ;;  %s15_s11 = sshll.u32 %s254_s0, 4  ;;  %s225_s12 = smov [#allocation2]   ;;  %s16_s11 = int_to_ptr.hbm [resolvable:$true] %s15_s11 }
   0x3   :  { %s17_s13 = sshll.u32 %s225_s12, 4  ;;  %s25_s16 = sshll.u32 %s255_s1, 4  ;;  %s18_s13 = int_to_ptr.vmem [resolvable:$true] %s17_s13  ;;  %s26_s16 = int_to_ptr.hbm [resolvable:$true] %s25_s16 }
   0x4   :  { %20 = dma.hbm_to_vmem [thread:$0]  %s16_s11, 128, %s18_s13, [#allocation3]  }
   0x5   :  { %s226_s17 = smov [#allocation5]   ;;  %s227_s19 = smov 256  }
   0x6   :  { %s27_s18 = sshll.u32 %s226_s17, 4  ;;  %s228_s20 = smov 16   ;;  %s28_s18 = int_to_ptr.vmem [resolvable:$true] %s27_s18 }
   0x7   :  { %33 = dma.hbm_to_vmem [thread:$0]  %s26_s16, 4096, %s28_s18, [#allocation6], %s227_s19, %s227_s19, %s228_s20  }
   0x8   :  { %219 = dma.done.wait [#allocation3], 128  }
   0x9   :  { %220 = vsyncadd [#allocation3], 4294967168 }
   0xa   :  { %221 = dma.done.wait [#allocation6], 4096  }
   0xb   :  { %222 = vsyncadd [#allocation6], 4294963200  ;;  %v73_v0 = vld [vmem:[#allocation5 + $0xf0] sm:$0xff]  ;;  %v74_v1 = vld [vmem:[#allocation5 + $0xf8] sm:$0xff]  ;;  %s229_s0 = smov [#allocation7]   ;;  %s129_s23 = sshll.u32 %s256_s2, 4  ;;  %s130_s23 = int_to_ptr.hbm [resolvable:$true] %s129_s23 }
   0xc   :  { %v71_v2 = vld [vmem:[#allocation5 + $0xe0] sm:$0xff]  ;;  %75 = vmatpush.msra.mxu0 %v73_v0  ;;  %95 = vmatpush.msra.mxu1 %v74_v1  ;;  %v72_v3 = vld [vmem:[#allocation5 + $0xe8] sm:$0xff]  ;;  %v69_v4 = vld [vmem:[#allocation5 + $0xd0] sm:$0xff]  ;;  %s127_s1 = sshll.u32 %s229_s0, 4  ;;  %s128_s1 = int_to_ptr.vmem [resolvable:$true] %s127_s1 }
   0xd   :  { %v70_v5 = vld [vmem:[#allocation5 + $0xd8] sm:$0xff]  ;;  %v67_v6 = vld [vmem:[#allocation5 + $0xc0] sm:$0xff]  ;;  %v68_v7 = vld [vmem:[#allocation5 + $0xc8] sm:$0xff] }
   0xe   :  { %76 = vmatpush.msra.mxu0 %v71_v2  ;;  %96 = vmatpush.msra.mxu1 %v72_v3  ;;  %v65_v8 = vld [vmem:[#allocation5 + $0xb0] sm:$0xff]  ;;  %v66_v9 = vld [vmem:[#allocation5 + $0xb8] sm:$0xff]  ;;  %v63_v10 = vld [vmem:[#allocation5 + $0xa0] sm:$0xff] }
   0xf   :  { %v64_v11 = vld [vmem:[#allocation5 + $0xa8] sm:$0xff]  ;;  %v61_v12 = vld [vmem:[#allocation5 + $0x90] sm:$0xff]  ;;  %v62_v13 = vld [vmem:[#allocation5 + $0x98] sm:$0xff] }
  0x10   :  { %77 = vmatpush.msra.mxu0 %v69_v4  ;;  %97 = vmatpush.msra.mxu1 %v70_v5  ;;  %v59_v14 = vld [vmem:[#allocation5 + $0x80] sm:$0xff]  ;;  %v60_v15 = vld [vmem:[#allocation5 + $0x88] sm:$0xff]  ;;  %v57_v16 = vld [vmem:[#allocation5 + $0x70] sm:$0xff] }
  0x11   :  { %v58_v17 = vld [vmem:[#allocation5 + $0x78] sm:$0xff]  ;;  %v55_v18 = vld [vmem:[#allocation5 + $0x60] sm:$0xff]  ;;  %v56_v19 = vld [vmem:[#allocation5 + $0x68] sm:$0xff] }
  0x12   :  { %78 = vmatpush.msra.mxu0 %v67_v6  ;;  %98 = vmatpush.msra.mxu1 %v68_v7  ;;  %v53_v20 = vld [vmem:[#allocation5 + $0x50] sm:$0xff]  ;;  %v54_v21 = vld [vmem:[#allocation5 + $0x58] sm:$0xff]  ;;  %v51_v22 = vld [vmem:[#allocation5 + $0x40] sm:$0xff] }
  0x13   :  { %v52_v23 = vld [vmem:[#allocation5 + $0x48] sm:$0xff]  ;;  %v49_v24 = vld [vmem:[#allocation5 + $0x30] sm:$0xff]  ;;  %v50_v25 = vld [vmem:[#allocation5 + $0x38] sm:$0xff] }
  0x14   :  { %79 = vmatpush.msra.mxu0 %v65_v8  ;;  %99 = vmatpush.msra.mxu1 %v66_v9  ;;  %v47_v26 = vld [vmem:[#allocation5 + $0x20] sm:$0xff]  ;;  %v48_v27 = vld [vmem:[#allocation5 + $0x28] sm:$0xff]  ;;  %v45_v28 = vld [vmem:[#allocation5 + $0x10] sm:$0xff] }
  0x15   :  { %v46_v29 = vld [vmem:[#allocation5 + $0x18] sm:$0xff]  ;;  %v43_v30 = vld [vmem:[#allocation5] sm:$0xff]  ;;  %v44_v31 = vld [vmem:[#allocation5 + $0x8] sm:$0xff] }
  0x16   :  { %80 = vmatpush.msra.mxu0 %v63_v10  ;;  %100 = vmatpush.msra.mxu1 %v64_v11  ;;  %v42_v32 = vld [vmem:[#allocation2] sm:$0xff] }
  0x18   :  { %81 = vmatpush.msra.mxu0 %v61_v12  ;;  %101 = vmatpush.msra.mxu1 %v62_v13 }
  0x1a   :  { %82 = vmatpush.msra.mxu0 %v59_v14  ;;  %102 = vmatpush.msra.mxu1 %v60_v15 }
  0x1c   :  { %83 = vmatpush.msra.mxu0 %v57_v16  ;;  %103 = vmatpush.msra.mxu1 %v58_v17 }
  0x1e   :  { %84 = vmatpush.msra.mxu0 %v55_v18  ;;  %104 = vmatpush.msra.mxu1 %v56_v19 }
  0x20   :  { %85 = vmatpush.msra.mxu0 %v53_v20  ;;  %105 = vmatpush.msra.mxu1 %v54_v21 }
  0x22   :  { %86 = vmatpush.msra.mxu0 %v51_v22  ;;  %106 = vmatpush.msra.mxu1 %v52_v23 }
  0x24   :  { %87 = vmatpush.msra.mxu0 %v49_v24  ;;  %107 = vmatpush.msra.mxu1 %v50_v25 }
  0x26   :  { %88 = vmatpush.msra.mxu0 %v47_v26  ;;  %108 = vmatpush.msra.mxu1 %v48_v27 }
  0x28   :  { %89 = vmatpush.msra.mxu0 %v45_v28  ;;  %109 = vmatpush.msra.mxu1 %v46_v29 }
  0x2a   :  { %90 = vmatpush.msra.mxu0 %v43_v30  ;;  %110 = vmatpush.msra.mxu1 %v44_v31 }
  0x2b   :  { %91 = vmatmul.f32.vlgmr.msra.gmra.mxu0 %v42_v32  ;;  %111 = vmatmul.f32.vlgmr.msra.gmra.mxu1 %v42_v32 }
  0xa8   :  { %v92_v33 = vpop.f32.mrf.mxu0  ;;  %v112_v34 = vpop.f32.mrf.mxu1 }
  0xa9   :  { %v115_v35 = vmul.f32 %v92_v33, %v92_v33  ;;  %v116_v36 = vmul.f32 %v112_v34, %v112_v34 }
  0xab   :  { %v117_v37 = vadd.f32 %v116_v36, %v115_v35 }
  0xad   :  { %145 = vlog2.f32 %v117_v37 }
  0xb3   :  { %v146_v38 = vpop.eup %145 }
  0xb4   :  { %v119_v39 = vmul.f32 0.6931472, %v146_v38 }
  0xb6   :  { %v120_v40 = vmul.f32 0.21714725, %v119_v39 }
  0xb8   :  { %121 = vst [vmem:[#allocation7] sm:$0xff] %v120_v40 }
  0xb9   :  { %132 = dma.vmem_to_hbm [thread:$0]  %s128_s1, 128, %s130_s23, [#allocation4]  }
  0xba   :  { %223 = dma.done.wait [#allocation4], 128  }
  0xbb   :  { %224 = vsyncadd [#allocation4], 4294967168 }
  0xbc   :  { %137 = vsyncpa [#allocation3], 1 }
  0xbd   :  { %138 = vsyncpa [#allocation6], 1 }
  0xbe   :  { %139 = vsyncpa [#allocation4], 1 }

</bundles_post_ra>
